<compile_context>
chip_gen: v7x
topology: tpu7x:2x2x1
jax: 0.10.0
libtpu: 0.0.40
codegen_flags: <defaults>
</compile_context>

<pallas_src>
import functools
import math

import jax
import jax.numpy as jnp
from jax import lax
from jax.experimental import pallas as pl
from jax.experimental.pallas import tpu as pltpu


def _cross_attention_kernel(x_ref, y_ref, w_ref, o_ref, *, dim):
    """One batch instance: fused QKV projection, softmax, p*V, fused concat store."""
    x = x_ref[...]                                   # (N, Dx)
    y = y_ref[...]                                   # (N, Dy)

    # Single fused MXU pass: [x | y] @ blockdiag(Wq/sqrt(dim), Wk, Wv).
    z = jnp.concatenate([x, y], axis=-1)             # (N, Dx+Dy)
    qkv = jnp.dot(z, w_ref[...], preferred_element_type=jnp.float32)  # (N, 3*dim)
    q = qkv[:, :dim]                                 # already scaled by 1/sqrt(dim)
    k = qkv[:, dim:2 * dim]
    v = qkv[:, 2 * dim:]

    # scores = (Q / sqrt(dim)) @ K^T  -> (N, N)
    scores = lax.dot_general(
        q, k, (((1,), (1,)), ((), ())), preferred_element_type=jnp.float32
    )

    # Numerically stable softmax; exact divide (approx vrcp broke 1e-5 tol).
    scores = scores - jnp.max(scores, axis=-1, keepdims=True)
    p = jnp.exp(scores)
    p = p / jnp.sum(p, axis=-1, keepdims=True)

    # Exactly what the PyTorch module does: `attn_weights * V` (elementwise).
    attn = p * v

    # One assembled store for the whole (N, Dx+dim) output slab.
    o_ref[...] = jnp.concatenate([x, attn], axis=-1).astype(o_ref.dtype)


def make_fused_weight(wq, wk, wv, dim):
    """Built ONCE at parameter init (off the hot path).

    Returns blockdiag(Wq * 1/sqrt(dim), [Wk | Wv]) of shape (Dx+Dy, 3*dim).
    """
    dx = wq.shape[0]
    dy = wk.shape[0]
    scale = jnp.float32(1.0 / math.sqrt(dim))
    w = jnp.zeros((dx + dy, 3 * dim), jnp.float32)
    w = w.at[:dx, :dim].set(wq.astype(jnp.float32) * scale)
    w = w.at[dx:, dim:2 * dim].set(wk.astype(jnp.float32))
    w = w.at[dx:, 2 * dim:].set(wv.astype(jnp.float32))
    return w


def cross_attention(x, y, w_fused, *, dim):
    """Pallas wrapper.

    x: (N, Dx) or (B, N, Dx); y: (N, Dy) or (B, N, Dy); w_fused from
    make_fused_weight. Returns concat([x, softmax(QK^T/sqrt(dim)) * V], -1).
    """
    squeeze = x.ndim == 2
    if squeeze:
        x, y = x[None], y[None]
    b, n, dx = x.shape
    _, _, dy = y.shape
    assert n == dim, "PyTorch's `attn_weights * V` broadcast requires N == dim"
    assert w_fused.shape == (dx + dy, 3 * dim)

    kernel = functools.partial(_cross_attention_kernel, dim=dim)

    out = pl.pallas_call(
        kernel,
        out_shape=jax.ShapeDtypeStruct((b, n, dx + dim), jnp.float32),
        grid_spec=pltpu.PrefetchScalarGridSpec(
            num_scalar_prefetch=0,
            grid=(b,),
            in_specs=[
                pl.BlockSpec((None, n, dx), lambda i: (i, 0, 0)),
                pl.BlockSpec((None, n, dy), lambda i: (i, 0, 0)),
                pl.BlockSpec((dx + dy, 3 * dim), lambda i: (0, 0)),
            ],
            out_specs=pl.BlockSpec((None, n, dx + dim), lambda i: (i, 0, 0)),
        ),
        compiler_params=pltpu.CompilerParams(
            dimension_semantics=("parallel",)
        ),
    )(x, y, w_fused)

    return out[0] if squeeze else out


def _xavier_uniform(key, fan_in, fan_out, dtype=jnp.float32):
    bound = math.sqrt(6.0 / (fan_in + fan_out))
    return jax.random.uniform(key, (fan_in, fan_out), dtype, -bound, bound)


def _reference(x, y, wq, wk, wv, dim):
    q = x @ wq
    k = y @ wk
    v = y @ wv
    s = (q @ k.T) / math.sqrt(dim)
    p = jax.nn.softmax(s, axis=-1)
    return jnp.concatenate([x, p * v], axis=-1)


if __name__ == "__main__":
    # Module config: dim = 8, input_shape = [(N, Dx), (N, Dy)]
    dim = 8
    N, Dx, Dy = 8, 16, 32   # N == dim required by the module's elementwise product

    key = jax.random.PRNGKey(0)
    kx, ky, kq, kk, kv, kbx, kby = jax.random.split(key, 7)

    x = jax.random.normal(kx, (N, Dx), dtype=jnp.float32)
    y = jax.random.normal(ky, (N, Dy), dtype=jnp.float32)
    Wq = _xavier_uniform(kq, Dx, dim)
    Wk = _xavier_uniform(kk, Dy, dim)
    Wv = _xavier_uniform(kv, Dy, dim)

    # Fused block-diagonal weight built once, off the per-call hot path.
    Wf = make_fused_weight(Wq, Wk, Wv, dim)

    # Single-instance path (the module's original 2-D forward).
    out = jax.block_until_ready(cross_attention(x, y, Wf, dim=dim))
    ref = _reference(x, y, Wq, Wk, Wv, dim)
    assert out.shape == (N, Dx + dim), out.shape
    assert jnp.allclose(out, ref, atol=1e-4, rtol=1e-4), "mismatch vs reference"

    # Batched path: B instances through one gridded pallas_call ("parallel" axis).
    B = 4
    xb = jax.random.normal(kbx, (B, N, Dx), dtype=jnp.float32)
    yb = jax.random.normal(kby, (B, N, Dy), dtype=jnp.float32)
    outb = jax.block_until_ready(cross_attention(xb, yb, Wf, dim=dim))
    refb = jax.vmap(lambda a, b: _reference(a, b, Wq, Wk, Wv, dim))(xb, yb)
    assert outb.shape == (B, N, Dx + dim), outb.shape
    assert jnp.allclose(outb, refb, atol=1e-4, rtol=1e-4), "batched mismatch"

    print("KERNEL_OK")
</pallas_src>

<mosaic_0001>
module attributes {stable_mosaic.version = 11 : i64} {
  func.func @_cross_attention_kernel(%arg0: i32, %arg1: memref<1x8x16xf32, #tpu.memory_space<vmem>>, %arg2: memref<1x8x32xf32, #tpu.memory_space<vmem>>, %arg3: memref<48x24xf32, #tpu.memory_space<vmem>>, %arg4: memref<1x8x24xf32, #tpu.memory_space<vmem>>) attributes {dimension_semantics = [#tpu.dimension_semantics<parallel>], iteration_bounds = array<i64: 1>, scalar_prefetch = 0 : i64, scratch_operands = 0 : i64, tpu.core_type = #tpu.core_type<tc>, window_params = [{transform_indices = @transform_0, window_bounds = array<i64: 1, 8, 16>}, {transform_indices = @transform_1, window_bounds = array<i64: 1, 8, 32>}, {pipeline_mode = #tpu.pipeline_mode<synchronous>, transform_indices = @transform_2, window_bounds = array<i64: 48, 24>}, {transform_indices = @transform_3, window_bounds = array<i64: 1, 8, 24>}]} {
    %c0 = arith.constant 0 : index
    %c0_0 = arith.constant 0 : index
    %c0_1 = arith.constant 0 : index
    %0 = vector.load %arg1[%c0, %c0_0, %c0_1] : memref<1x8x16xf32, #tpu.memory_space<vmem>>, vector<1x8x16xf32>
    %1 = vector.shape_cast %0 : vector<1x8x16xf32> to vector<8x16xf32>
    %c0_2 = arith.constant 0 : index
    %c0_3 = arith.constant 0 : index
    %c0_4 = arith.constant 0 : index
    %2 = vector.load %arg2[%c0_2, %c0_3, %c0_4] : memref<1x8x32xf32, #tpu.memory_space<vmem>>, vector<1x8x32xf32>
    %3 = vector.shape_cast %2 : vector<1x8x32xf32> to vector<8x32xf32>
    %4 = tpu.concatenate %1, %3 in 1 : vector<8x16xf32>, vector<8x32xf32> -> vector<8x48xf32>
    %c0_5 = arith.constant 0 : index
    %c0_6 = arith.constant 0 : index
    %5 = vector.load %arg3[%c0_5, %c0_6] : memref<48x24xf32, #tpu.memory_space<vmem>>, vector<48x24xf32>
    %cst = arith.constant dense<0.000000e+00> : vector<8x24xf32>
    %6 = tpu.matmul %4, %5, %cst {dimension_numbers = #tpu.dot_dimension_numbers<[1], [0], [0], [1], [0, 0, 1, 1], [], []>} : vector<8x48xf32>, vector<48x24xf32>, vector<8x24xf32> -> vector<8x24xf32>
    %7 = vector.extract_strided_slice %6 {offsets = [0, 0], sizes = [8, 8], strides = [1, 1]} : vector<8x24xf32> to vector<8x8xf32>
    %8 = vector.extract_strided_slice %6 {offsets = [0, 8], sizes = [8, 8], strides = [1, 1]} : vector<8x24xf32> to vector<8x8xf32>
    %9 = vector.extract_strided_slice %6 {offsets = [0, 16], sizes = [8, 8], strides = [1, 1]} : vector<8x24xf32> to vector<8x8xf32>
    %cst_7 = arith.constant dense<0.000000e+00> : vector<8x8xf32>
    %10 = tpu.matmul %7, %8, %cst_7 {dimension_numbers = #tpu.dot_dimension_numbers<[1], [1], [0], [0], [0, 0, 1, 0], [], []>} : vector<8x8xf32>, vector<8x8xf32>, vector<8x8xf32> -> vector<8x8xf32>
    %cst_8 = arith.constant dense<0xFF800000> : vector<8xf32>
    %11 = vector.multi_reduction <maximumf>, %10, %cst_8 [1] : vector<8x8xf32> to vector<8xf32>
    %12 = vector.shape_cast %11 : vector<8xf32> to vector<8x1xf32>
    %13 = vector.broadcast %12 : vector<8x1xf32> to vector<8x8xf32>
    %14 = arith.subf %10, %13 : vector<8x8xf32>
    %15 = math.exp %14 : vector<8x8xf32>
    %cst_9 = arith.constant dense<0.000000e+00> : vector<8xf32>
    %16 = vector.multi_reduction <add>, %15, %cst_9 [1] : vector<8x8xf32> to vector<8xf32>
    %17 = vector.shape_cast %16 : vector<8xf32> to vector<8x1xf32>
    %18 = vector.broadcast %17 : vector<8x1xf32> to vector<8x8xf32>
    %19 = arith.divf %15, %18 : vector<8x8xf32>
    %20 = arith.mulf %19, %9 : vector<8x8xf32>
    %21 = tpu.concatenate %1, %20 in 1 : vector<8x16xf32>, vector<8x8xf32> -> vector<8x24xf32>
    %c0_10 = arith.constant 0 : index
    %c0_11 = arith.constant 0 : index
    %c0_12 = arith.constant 0 : index
    %22 = vector.load %arg4[%c0_10, %c0_11, %c0_12] : memref<1x8x24xf32, #tpu.memory_space<vmem>>, vector<1x8x24xf32>
    %23 = vector.shape_cast %22 : vector<1x8x24xf32> to vector<8x24xf32>
    %24 = vector.shape_cast %21 : vector<8x24xf32> to vector<1x8x24xf32>
    tpu.vector_store %arg4[%c0_10, %c0_11, %c0_12], %24 {strides = array<i32>} : memref<1x8x24xf32, #tpu.memory_space<vmem>>, vector<1x8x24xf32>,
    return
  }
  func.func @transform_0(%arg0: i32) -> (i32, i32, i32) {
    %c0_i32 = arith.constant 0 : i32
    %c0_i32_0 = arith.constant 0 : i32
    %c0_i32_1 = arith.constant 0 : i32
    return %arg0, %c0_i32, %c0_i32_0 : i32, i32, i32
  }
  func.func @transform_1(%arg0: i32) -> (i32, i32, i32) {
    %c0_i32 = arith.constant 0 : i32
    %c0_i32_0 = arith.constant 0 : i32
    %c0_i32_1 = arith.constant 0 : i32
    return %arg0, %c0_i32, %c0_i32_0 : i32, i32, i32
  }
  func.func @transform_2(%arg0: i32) -> (i32, i32) {
    %c0_i32 = arith.constant 0 : i32
    %c0_i32_0 = arith.constant 0 : i32
    %c0_i32_1 = arith.constant 0 : i32
    return %c0_i32, %c0_i32_0 : i32, i32
  }
  func.func @transform_3(%arg0: i32) -> (i32, i32, i32) {
    %c0_i32 = arith.constant 0 : i32
    %c0_i32_0 = arith.constant 0 : i32
    %c0_i32_1 = arith.constant 0 : i32
    return %arg0, %c0_i32, %c0_i32_0 : i32, i32, i32
  }
}

</mosaic_0001>

<bundles_post_ra>
// kernel: tpu_custom_call.1
= control target key start
LH: loop header
LB: loop body
LE: loop exit
PB: predicated region body
PF: predicated region fallthrough
CT: control target
= control target key end

     0   :  { %s293_s18 = smov 16   ;;  %v294_v3 = vmov 0.0|0.0   ;;  %vm295_vm0 = vmmov 0   ;;  %v296_v7 = vmov 0.0   ;;  %s360_s0 = inlined_call_operand.vmem [shape: f32[1,8,16], index: 0, kind: input, shape index: {}]   ;;  %s361_s1 = inlined_call_operand.vmem [shape: f32[1,8,32], index: 1, kind: input, shape index: {}]   ;;  %s362_s2 = inlined_call_operand.vmem [shape: f32[48,24], index: 2, kind: input, shape index: {}]   ;;  %s363_s3 = inlined_call_operand.hbm [shape: f32[1,8,24], index: 3, kind: output, shape index: {}]  }
   0x1   :  { %v16_v0 = vld [vmem:[%s361_s1] sm:$0xff]  ;;  %v24_v2 = vld [vmem:[%s362_s2 + $0x8] sm:$0xff]  ;;  %249 = vmatprep.subr.bf16.mxu0 %v294_v3  ;;  %v25_v5 = vld [vmem:[%s362_s2 + $0x10] sm:$0xff]  ;;  %241 = vmatprep.mubr.msk.f32.mxu0 %vm295_vm0, %v296_v7 }
   0x2   :  { %v23_v1 = vld [vmem:[%s362_s2] sm:$0xff]  ;;  %18 = vrot.lane.b32.xlu0 %v16_v0, %s293_s18  ;;  %v26_v6 = vld [vmem:[%s362_s2 + $0x18] sm:$0xff]  ;;  %244 = vmatprep.subr.mxu1 %v296_v7 }
   0x3   :  { %v250_v4 = vpack.c.bf16 %v24_v2, %v23_v1 }
   0x4   :  { %8 = vsyncpa [#allocation3], 0  ;;  %v253_v8 = vpack.c.bf16 %v26_v6, %v25_v5  ;;  %246 = vmatprep.mubr.msk.f32.mxu1 %vm295_vm0, %v296_v7  ;;  %v27_v9 = vld [vmem:[%s362_s2 + $0x20] sm:$0xff]  ;;  %v28_v10 = vld [vmem:[%s362_s2 + $0x28] sm:$0xff]  ;;  %vm21_vm1 = vcmask 130048   ;;  %vm29_vm2 = vcmask 392192  }
   0x5   :  { %251 = vmatpush3.bf16.msra.mxu0 %v250_v4  ;;  %v256_v11 = vpack.c.bf16 %v28_v10, %v27_v9  ;;  %v15_v12 = vld [vmem:[%s360_s0] sm:$0xff]  ;;  %s297_s28 = smov 120   ;;  %s298_s29 = smov 112   ;;  %vm106_vm3 = vcmask 64512   ;;  %vm201_vm4 = vcmask 195584  }
   0x6   :  { %252 = vmatprep.subr.bf16.mxu0 %v294_v3  ;;  %s299_s0 = smov [#allocation2]  }
   0x7   :  { %s209_s2 = sshll.u32 %s299_s0, 4  ;;  %s210_s2 = int_to_ptr.vmem [resolvable:$true] %s209_s2 }
   0x8   :  { %s269_s30 = scalar_lea.vmem %s210_s2, 128  ;;  %p274_p1 = scmp.lt.s32.totalorder %s210_s2, %s210_s2 }
   0x9   :  { %254 = vmatpush3.bf16.msra.mxu0 %v253_v8  ;;  %p270_p0 = scmp.ne.s32.totalorder %s210_s2, %s269_s30  ;;  %p275_p2 = scmp.lt.s32.totalorder %s269_s30, %s269_s30 }
   0xa   :  { %255 = vmatprep.subr.bf16.mxu0 %v294_v3 }
   0xb   :  { %p276_p3 = por %p275_p2, %p274_p1 }
   0xd   :  { %257 = vmatpush3.bf16.msra.mxu0 %v256_v11  ;;  %p277_p4 = pnand %p276_p3, %p270_p0 }
  0x74   :  { %v19_v13 = vpop.permute.xlu0 %18 }
  0x75   :  { %v22_v14 = vsel %vm21_vm1, %v15_v12, %v19_v13 }
  0x76   :  { %242 = vmatmul.mubr.msk.f32.vlgmr.msra.gmra.mrb[0].mxu0 %vm29_vm2, %v22_v14 }
 0x149   :  { %v99_v15 = vpop.f32.mrb[0].mxu0 }
 0x14a   :  { %104 = vrot.lane.b32.xlu0 %v99_v15, %s297_s28  ;;  %v243_v16 = vpop.f32.mrb[1].mxu0 }
 0x14e   :  { %192 = vrot.lane.b32.xlu0 %v99_v15, %s298_s29 }
 0x1bc   :  { %v105_v17 = vpop.permute.xlu0 %104 }
 0x1bd   :  { %245 = vmatpush3.xpose.msk.msra.mxu1 %vm106_vm3, %v105_v17 }
 0x1c0   :  { %247 = vmatmul.mubr.msk.f32.vlgmr.msra.gmra.mrb[0].mxu1 %vm106_vm3, %v99_v15  ;;  %v193_v29 = vpop.permute.xlu0 %192 }
 0x293   :  { %v177_v18 = vpop.f32.mrb[0].mxu1 }
 0x294   :  { %v248_v19 = vpop.f32.mrb[1].mxu1  ;;  %v181_v20 = vsel %vm106_vm3, %v177_v18, -inf }
 0x295   :  { %182 = vmax.xlane.f32.xlu1 %v181_v20 }
 0x322   :  { %v183_v21 = vpop.xlane.xlu1 %182 }
 0x323   :  { %v184_v22 = vsub.f32 %v177_v18, %v183_v21 }
 0x325   :  { %v185_v23 = vmul.f32 1.442695, %v184_v22 }
 0x327   :  { %265 = vpow2.f32 %v185_v23 }
 0x331   :  { %v266_v24 = vpop.eup %265 }
 0x332   :  { %v187_v25 = vsel %vm106_vm3, %v266_v24, 0.0 }
 0x333   :  { %188 = vadd.xlane.f32.xlu1 %v187_v25 }
 0x3c0   :  { %v189_v26 = vpop.xlane.xlu1 %188 }
 0x3c1   :  { %267 = vrcp.f32 %v189_v26 }
 0x3cb   :  { %v268_v27 = vpop.eup %267 }
 0x3cc   :  { %v191_v28 = vmul.f32 %v268_v27, %v266_v24 }
 0x3ce   :  { %v195_v30 = vmul.f32 %v193_v29, %v191_v28 }
 0x3d0   :  { %197 = vrot.lane.b32.xlu1 %v195_v30, %s293_s18 }
 0x442   :  { %v198_v31 = vpop.permute.xlu1 %197 }
 0x443   :  { %v200_v32 = vsel %vm21_vm1, %v15_v12, %v198_v31 }
 0x444   :  { %202 = vst.msk [vmem:[#allocation2] sm:$0xff] %vm201_vm4, %v200_v32 }
 0x445   :  { %280 = shalt.err (!%p277_p4)
}
 0x446   :  { %s281_s6 = scalar_lea.hbm %s363_s3, 128 }
 0x447   :  { %p282_p5 = scmp.ne.s32.totalorder %s363_s3, %s281_s6  ;;  %p285_p6 = scmp.lt.u32.totalorder %s281_s6, %s363_s3 }
 0x449   :  { %p287_p7 = pnand %p285_p6, %p282_p5 }
 0x44b   :  { %290 = shalt.err (!%p287_p7)
}
 0x44c   :  { %212 = dma.vmem_to_hbm [thread:$0]  %s210_s2, 128, %s363_s3, [#allocation3]  }
 0x44d   :  { %291 = dma.done.wait [#allocation3], 128  }
 0x44e   :  { %292 = vsyncadd [#allocation3], 4294967168 }
 0x44f   :  { %216 = vsyncpa [#allocation3], 1 }

</bundles_post_ra>
